<compile_context>
chip_gen: v5e
topology: v5e:2x2
jax: 0.10.0
libtpu: 0.0.40
codegen_flags: <defaults>
</compile_context>

<pallas_src>
import functools

import jax
import jax.numpy as jnp
from jax.experimental import pallas as pl
from jax.experimental.pallas import tpu as pltpu


def _round_up(x, m):
    return ((x + m - 1) // m) * m


def projector_kernel(x_ref, w1t_ref, bgb_ref, w2t_ref, b2_ref, o_ref, *,
                     true_hidden):
    # ----- Linear 1: (bm, in) @ (in, Hp) — bf16 operands, f32 accumulate -----
    x = x_ref[...].astype(jnp.bfloat16)
    h = jnp.dot(x, w1t_ref[...], preferred_element_type=jnp.float32)
    bgb = bgb_ref[...]                                # (3, Hp): [b1; gamma; beta]
    h = h + bgb[0:1, :]

    # ----- LayerNorm over the TRUE hidden dim (eps=1e-5, affine) -----
    # Two-pass masked statistics: lanes >= true_hidden are excluded, and
    # mean-centering before squaring avoids E[h^2]-mean^2 cancellation.
    lane = jax.lax.broadcasted_iota(jnp.int32, h.shape, 1)
    valid = lane < true_hidden
    inv_h = 1.0 / float(true_hidden)
    mean = jnp.sum(jnp.where(valid, h, 0.0), axis=-1, keepdims=True) * inv_h
    centered = jnp.where(valid, h - mean, 0.0)
    var = jnp.sum(centered * centered, axis=-1, keepdims=True) * inv_h
    hn = centered * jax.lax.rsqrt(var + 1e-5)         # rsqrt -> EUP slot
    hn = hn * bgb[1:2, :] + bgb[2:3, :]

    # ----- ReLU -----
    hr = jnp.maximum(hn, 0.0)

    # ----- Dropout (eval mode -> identity) -----
    # TODO(synk): training-mode dropout needs pltpu.prng_seed / prng_random_bits.

    # ----- Linear 2: (bm, Hp) @ (Hp, out).  Padded Hp rows of W2^T are zero,
    # so values in the padded hidden lanes can never leak into the output. -----
    out = jnp.dot(hr.astype(jnp.bfloat16), w2t_ref[...],
                  preferred_element_type=jnp.float32) + b2_ref[...]
    o_ref[...] = out.astype(o_ref.dtype)


def prepare_params(params):
    """One-time weight prep: transpose + lane-pad the hidden dim + bf16 cast.

    Call once per parameter set and reuse (hoisted out of the forward path per
    the perf review).  PyTorch shapes expected: w1 (H, In), b1 (H,),
    ln_w/ln_b (H,), w2 (Out, H), b2 (Out,).
    """
    hidden_dim, input_dim = params["w1"].shape
    output_dim = params["w2"].shape[0]
    Hp = _round_up(hidden_dim, 128)                   # lane-dense hidden dim

    w1t = (jnp.zeros((input_dim, Hp), jnp.float32)
           .at[:, :hidden_dim].set(params["w1"].T)
           .astype(jnp.bfloat16))
    # b1 / gamma / beta fused into one small VMEM-resident (3, Hp) array.
    bgb = (jnp.zeros((3, Hp), jnp.float32)
           .at[0, :hidden_dim].set(params["b1"])
           .at[1, :hidden_dim].set(params["ln_w"])
           .at[2, :hidden_dim].set(params["ln_b"]))
    # NOTE: rows [hidden_dim:Hp] of w2t MUST stay zero — they are what keeps the
    # padded hidden lanes out of the output (see kernel).
    w2t = (jnp.zeros((Hp, output_dim), jnp.float32)
           .at[:hidden_dim, :].set(params["w2"].T)
           .astype(jnp.bfloat16))
    b2 = params["b2"].reshape(1, output_dim).astype(jnp.float32)

    return {"w1t": w1t, "bgb": bgb, "w2t": w2t, "b2": b2,
            "input_dim": input_dim, "hidden_dim": hidden_dim,
            "output_dim": output_dim, "Hp": Hp}


def projector_forward(x, prepped, *, block_m=512, out_dtype=None):
    """x: (B, input_dim).  prepped: output of prepare_params().

    block_m: batch rows per grid step.  Sweep 256/512/1024 for large B; on v7x
    pick the largest value that still leaves >= 2 grid steps so both
    TensorCores get work.  Pass out_dtype=jnp.bfloat16 to halve output
    writeback if downstream tolerates it.  x may already be bf16 (no wrapper
    cast is added either way).
    """
    B, input_dim = x.shape
    assert input_dim == prepped["input_dim"]
    hidden_dim = prepped["hidden_dim"]
    output_dim = prepped["output_dim"]
    Hp = prepped["Hp"]
    out_dtype = jnp.dtype(x.dtype if out_dtype is None else out_dtype)

    # Batch tile: no host-side padding copy of x; the last (partial) block is
    # handled by Pallas (masked writeback) and the math is row-local.
    bm = min(_round_up(block_m, 8), _round_up(B, 8))
    grid = (pl.cdiv(B, bm),)

    # VMEM budget: double-buffered x/out tiles + single-copy weights + f32/bf16
    # hidden temporaries.  Raise the scoped limit accordingly (v5e default is
    # only 16 MiB) while staying well under v7x's 64 MiB physical VMEM.
    bytes_io = 2 * bm * (input_dim * x.dtype.itemsize
                         + output_dim * out_dtype.itemsize)
    bytes_w = 2 * (input_dim * Hp + Hp * output_dim) + 4 * (3 * Hp + output_dim)
    bytes_tmp = 14 * bm * Hp          # h/centered/hn f32 + bf16 copy + slack
    vmem_limit = int(min(100 * 2**20,
                         max(2 * (bytes_io + bytes_w + bytes_tmp), 16 * 2**20)))

    flops = 2 * B * Hp * (input_dim + output_dim) + 10 * B * Hp
    bytes_accessed = (B * input_dim * x.dtype.itemsize
                      + B * output_dim * out_dtype.itemsize + bytes_w)

    # Whole-array VMEM residents: single copy, no dead second pipeline buffer.
    vmem_resident = pl.BlockSpec(memory_space=pltpu.MemorySpace.VMEM)

    kernel = functools.partial(projector_kernel, true_hidden=hidden_dim)
    return pl.pallas_call(
        kernel,
        out_shape=jax.ShapeDtypeStruct((B, output_dim), out_dtype),
        grid_spec=pltpu.PrefetchScalarGridSpec(
            num_scalar_prefetch=0,
            grid=grid,
            in_specs=[
                pl.BlockSpec((bm, input_dim), lambda i: (i, 0)),  # x tile
                vmem_resident,                                    # W1^T (bf16)
                vmem_resident,                                    # [b1;gamma;beta]
                vmem_resident,                                    # W2^T (bf16)
                vmem_resident,                                    # b2
            ],
            # Unpadded output block: last dim == output_dim (full array dim) so
            # only output_dim*itemsize bytes/row are written and no post-kernel
            # slice is needed (masked vst on the narrow lanes is far cheaper
            # than 8x-padded writeback + a second slice pass here).
            out_specs=pl.BlockSpec((bm, output_dim), lambda i: (i, 0)),
        ),
        compiler_params=pltpu.CompilerParams(
            dimension_semantics=("parallel",),
            vmem_limit_bytes=vmem_limit),
        cost_estimate=pl.CostEstimate(flops=flops, transcendentals=B,
                                      bytes_accessed=bytes_accessed),
    )(x, prepped["w1t"], prepped["bgb"], prepped["w2t"], prepped["b2"])


def init_params(key, input_dim, hidden_dim, output_dim):
    """Deterministic synthetic params with PyTorch-style shapes."""
    k1, k2, k3, k4 = jax.random.split(key, 4)
    s1 = 1.0 / jnp.sqrt(input_dim)
    s2 = 1.0 / jnp.sqrt(hidden_dim)
    return {
        "w1": jax.random.uniform(k1, (hidden_dim, input_dim), jnp.float32, -s1, s1),
        "b1": jax.random.uniform(k2, (hidden_dim,), jnp.float32, -s1, s1),
        "ln_w": jnp.ones((hidden_dim,), jnp.float32),
        "ln_b": jnp.zeros((hidden_dim,), jnp.float32),
        "w2": jax.random.uniform(k3, (output_dim, hidden_dim), jnp.float32, -s2, s2),
        "b2": jax.random.uniform(k4, (output_dim,), jnp.float32, -s2, s2),
    }


def reference_forward_bf16(x, p):
    """Reference using the same bf16-operand / f32-accumulate matmul path."""
    h = jnp.dot(x.astype(jnp.bfloat16), p["w1"].T.astype(jnp.bfloat16),
                preferred_element_type=jnp.float32) + p["b1"]
    mean = jnp.mean(h, axis=-1, keepdims=True)
    var = jnp.mean((h - mean) ** 2, axis=-1, keepdims=True)
    hn = (h - mean) * jax.lax.rsqrt(var + 1e-5) * p["ln_w"] + p["ln_b"]
    hr = jnp.maximum(hn, 0.0)
    return jnp.dot(hr.astype(jnp.bfloat16), p["w2"].T.astype(jnp.bfloat16),
                   preferred_element_type=jnp.float32) + p["b2"]


def reference_forward_f32(x, p):
    """Pure f32 PyTorch-semantics reference (eval-mode dropout)."""
    h = x @ p["w1"].T + p["b1"]
    mean = jnp.mean(h, axis=-1, keepdims=True)
    var = jnp.mean((h - mean) ** 2, axis=-1, keepdims=True)
    hn = (h - mean) / jnp.sqrt(var + 1e-5) * p["ln_w"] + p["ln_b"]
    hr = jnp.maximum(hn, 0.0)
    return hr @ p["w2"].T + p["b2"]


if __name__ == "__main__":
    input_dim, hidden_dim, output_dim = 32, 64, 16
    batch = 200   # not a multiple of block_m: exercises the masked tail block

    key = jax.random.PRNGKey(0)
    kx, kp = jax.random.split(key)
    x = jax.random.normal(kx, (batch, input_dim), jnp.float32)
    params = init_params(kp, input_dim, hidden_dim, output_dim)
    prepped = prepare_params(params)        # one-time weight prep (hoisted)

    # block_m=128 -> grid=(2,) with a 72-row masked tail; keeps >=2 grid steps
    # so both v7x TensorCores get work.  For large B sweep {256, 512, 1024}.
    out = projector_forward(x, prepped, block_m=128)
    out = jax.block_until_ready(out)

    assert out.shape == (batch, output_dim)
    assert out.dtype == x.dtype
    assert bool(jnp.all(jnp.isfinite(out)))

    # Tight check vs a reference using the same bf16 matmul path.
    ref_bf16 = reference_forward_bf16(x, params)
    assert jnp.allclose(out, ref_bf16, atol=5e-3, rtol=5e-3), \
        "mismatch vs bf16-matmul reference"

    # Loose sanity check vs the pure-f32 PyTorch-semantics reference.
    ref_f32 = reference_forward_f32(x, params)
    assert jnp.allclose(out, ref_f32, atol=5e-2, rtol=5e-2), \
        "mismatch vs f32 reference"

    print("KERNEL_OK")
</pallas_src>

<mosaic_0001>
module attributes {stable_mosaic.version = 11 : i64} {
  func.func @projector_kernel(%arg0: i32, %arg1: memref<128x32xf32, #tpu.memory_space<vmem>>, %arg2: memref<32x128xbf16, #tpu.memory_space<vmem>>, %arg3: memref<3x128xf32, #tpu.memory_space<vmem>>, %arg4: memref<128x16xbf16, #tpu.memory_space<vmem>>, %arg5: memref<1x16xf32, #tpu.memory_space<vmem>>, %arg6: memref<128x16xf32, #tpu.memory_space<vmem>>) attributes {dimension_semantics = [#tpu.dimension_semantics<parallel>], iteration_bounds = array<i64: 2>, scalar_prefetch = 0 : i64, scratch_operands = 0 : i64, tpu.core_type = #tpu.core_type<tc>, window_params = [{transform_indices = @transform_0, window_bounds = array<i64: 128, 32>}, {pipeline_mode = #tpu.pipeline_mode<synchronous>, transform_indices = @transform_1, window_bounds = array<i64: 32, 128>}, {pipeline_mode = #tpu.pipeline_mode<synchronous>, transform_indices = @transform_2, window_bounds = array<i64: 3, 128>}, {pipeline_mode = #tpu.pipeline_mode<synchronous>, transform_indices = @transform_3, window_bounds = array<i64: 128, 16>}, {pipeline_mode = #tpu.pipeline_mode<synchronous>, transform_indices = @transform_4, window_bounds = array<i64: 1, 16>}, {transform_indices = @transform_5, window_bounds = array<i64: 128, 16>}]} {
    %c0 = arith.constant 0 : index
    %c0_0 = arith.constant 0 : index
    %0 = vector.load %arg1[%c0, %c0_0] : memref<128x32xf32, #tpu.memory_space<vmem>>, vector<128x32xf32>
    %1 = arith.truncf %0 : vector<128x32xf32> to vector<128x32xbf16>
    %c0_1 = arith.constant 0 : index
    %c0_2 = arith.constant 0 : index
    %2 = vector.load %arg2[%c0_1, %c0_2] : memref<32x128xbf16, #tpu.memory_space<vmem>>, vector<32x128xbf16>
    %cst = arith.constant dense<0.000000e+00> : vector<128x128xf32>
    %3 = tpu.matmul %1, %2, %cst {dimension_numbers = #tpu.dot_dimension_numbers<[1], [0], [0], [1], [0, 0, 1, 1], [], []>} : vector<128x32xbf16>, vector<32x128xbf16>, vector<128x128xf32> -> vector<128x128xf32>
    %c0_3 = arith.constant 0 : index
    %c0_4 = arith.constant 0 : index
    %4 = vector.load %arg3[%c0_3, %c0_4] : memref<3x128xf32, #tpu.memory_space<vmem>>, vector<3x128xf32>
    %5 = vector.extract_strided_slice %4 {offsets = [0, 0], sizes = [1, 128], strides = [1, 1]} : vector<3x128xf32> to vector<1x128xf32>
    %6 = vector.broadcast %5 : vector<1x128xf32> to vector<128x128xf32>
    %7 = arith.addf %3, %6 : vector<128x128xf32>
    %8 = tpu.iota {dimensions = array<i32: 1>} : vector<128x128xi32>
    %c64_i32 = arith.constant 64 : i32
    %9 = vector.broadcast %c64_i32 : i32 to vector<128x128xi32>
    %10 = arith.cmpi slt, %8, %9 : vector<128x128xi32>
    %cst_5 = arith.constant 0.000000e+00 : f32
    %11 = vector.broadcast %cst_5 : f32 to vector<128x128xf32>
    %12 = arith.select %10, %7, %11 : vector<128x128xi1>, vector<128x128xf32>
    %cst_6 = arith.constant dense<0.000000e+00> : vector<128xf32>
    %13 = vector.multi_reduction <add>, %12, %cst_6 [1] : vector<128x128xf32> to vector<128xf32>
    %14 = vector.shape_cast %13 : vector<128xf32> to vector<128x1xf32>
    %cst_7 = arith.constant 1.562500e-02 : f32
    %15 = vector.broadcast %cst_7 : f32 to vector<128x1xf32>
    %16 = arith.mulf %14, %15 : vector<128x1xf32>
    %17 = vector.broadcast %16 : vector<128x1xf32> to vector<128x128xf32>
    %18 = arith.subf %7, %17 : vector<128x128xf32>
    %cst_8 = arith.constant 0.000000e+00 : f32
    %19 = vector.broadcast %cst_8 : f32 to vector<128x128xf32>
    %20 = arith.select %10, %18, %19 : vector<128x128xi1>, vector<128x128xf32>
    %21 = arith.mulf %20, %20 : vector<128x128xf32>
    %cst_9 = arith.constant dense<0.000000e+00> : vector<128xf32>
    %22 = vector.multi_reduction <add>, %21, %cst_9 [1] : vector<128x128xf32> to vector<128xf32>
    %23 = vector.shape_cast %22 : vector<128xf32> to vector<128x1xf32>
    %cst_10 = arith.constant 1.562500e-02 : f32
    %24 = vector.broadcast %cst_10 : f32 to vector<128x1xf32>
    %25 = arith.mulf %23, %24 : vector<128x1xf32>
    %cst_11 = arith.constant 9.99999974E-6 : f32
    %26 = vector.broadcast %cst_11 : f32 to vector<128x1xf32>
    %27 = arith.addf %25, %26 : vector<128x1xf32>
    %28 = math.rsqrt %27 : vector<128x1xf32>
    %29 = vector.broadcast %28 : vector<128x1xf32> to vector<128x128xf32>
    %30 = arith.mulf %20, %29 : vector<128x128xf32>
    %31 = vector.extract_strided_slice %4 {offsets = [1, 0], sizes = [1, 128], strides = [1, 1]} : vector<3x128xf32> to vector<1x128xf32>
    %32 = vector.broadcast %31 : vector<1x128xf32> to vector<128x128xf32>
    %33 = arith.mulf %30, %32 : vector<128x128xf32>
    %34 = vector.extract_strided_slice %4 {offsets = [2, 0], sizes = [1, 128], strides = [1, 1]} : vector<3x128xf32> to vector<1x128xf32>
    %35 = vector.broadcast %34 : vector<1x128xf32> to vector<128x128xf32>
    %36 = arith.addf %33, %35 : vector<128x128xf32>
    %cst_12 = arith.constant 0.000000e+00 : f32
    %37 = vector.broadcast %cst_12 : f32 to vector<128x128xf32>
    %38 = arith.maximumf %36, %37 : vector<128x128xf32>
    %39 = arith.truncf %38 : vector<128x128xf32> to vector<128x128xbf16>
    %c0_13 = arith.constant 0 : index
    %c0_14 = arith.constant 0 : index
    %40 = vector.load %arg4[%c0_13, %c0_14] : memref<128x16xbf16, #tpu.memory_space<vmem>>, vector<128x16xbf16>
    %cst_15 = arith.constant dense<0.000000e+00> : vector<128x16xf32>
    %41 = tpu.matmul %39, %40, %cst_15 {dimension_numbers = #tpu.dot_dimension_numbers<[1], [0], [0], [1], [0, 0, 1, 1], [], []>} : vector<128x128xbf16>, vector<128x16xbf16>, vector<128x16xf32> -> vector<128x16xf32>
    %c0_16 = arith.constant 0 : index
    %c0_17 = arith.constant 0 : index
    %42 = vector.load %arg5[%c0_16, %c0_17] : memref<1x16xf32, #tpu.memory_space<vmem>>, vector<1x16xf32>
    %43 = vector.broadcast %42 : vector<1x16xf32> to vector<128x16xf32>
    %44 = arith.addf %41, %43 : vector<128x16xf32>
    %c0_18 = arith.constant 0 : index
    %c0_19 = arith.constant 0 : index
    %45 = vector.load %arg6[%c0_18, %c0_19] : memref<128x16xf32, #tpu.memory_space<vmem>>, vector<128x16xf32>
    tpu.vector_store %arg6[%c0_18, %c0_19], %44 {strides = array<i32>} : memref<128x16xf32, #tpu.memory_space<vmem>>, vector<128x16xf32>,
    return
  }
  func.func @transform_0(%arg0: i32) -> (i32, i32) {
    %c0_i32 = arith.constant 0 : i32
    %c0_i32_0 = arith.constant 0 : i32
    return %arg0, %c0_i32 : i32, i32
  }
  func.func @transform_1(%arg0: i32) -> (i32, i32) {
    %c0_i32 = arith.constant 0 : i32
    %c0_i32_0 = arith.constant 0 : i32
    %c0_i32_1 = arith.constant 0 : i32
    return %c0_i32, %c0_i32_0 : i32, i32
  }
  func.func @transform_2(%arg0: i32) -> (i32, i32) {
    %c0_i32 = arith.constant 0 : i32
    %c0_i32_0 = arith.constant 0 : i32
    %c0_i32_1 = arith.constant 0 : i32
    return %c0_i32, %c0_i32_0 : i32, i32
  }
  func.func @transform_3(%arg0: i32) -> (i32, i32) {
    %c0_i32 = arith.constant 0 : i32
    %c0_i32_0 = arith.constant 0 : i32
    %c0_i32_1 = arith.constant 0 : i32
    return %c0_i32, %c0_i32_0 : i32, i32
  }
  func.func @transform_4(%arg0: i32) -> (i32, i32) {
    %c0_i32 = arith.constant 0 : i32
    %c0_i32_0 = arith.constant 0 : i32
    %c0_i32_1 = arith.constant 0 : i32
    return %c0_i32, %c0_i32_0 : i32, i32
  }
  func.func @transform_5(%arg0: i32) -> (i32, i32) {
    %c0_i32 = arith.constant 0 : i32
    %c0_i32_0 = arith.constant 0 : i32
    return %arg0, %c0_i32 : i32, i32
  }
}

</mosaic_0001>

<bundles_post_ra>
// kernel: tpu_custom_call.1
= control target key start
LH: loop header
LB: loop body
LE: loop exit
PB: predicated region body
PF: predicated region fallthrough
CT: control target
= control target key end

     0   :  { %s1520_s18 = smov 0   ;;  %s1522_s19 = smov 0   ;;  %s2181_s0 = inlined_call_operand.vmem [shape: f32[200,32], index: 0, kind: input, shape index: {}]   ;;  %s2182_s1 = inlined_call_operand.vmem [shape: bf16[32,128], index: 1, kind: input, shape index: {}]   ;;  %s2183_s2 = inlined_call_operand.vmem [shape: f32[3,128], index: 2, kind: input, shape index: {}]   ;;  %s2184_s3 = inlined_call_operand.vmem [shape: bf16[128,16], index: 3, kind: input, shape index: {}]   ;;  %s2185_s4 = inlined_call_operand.vmem [shape: f32[1,16], index: 4, kind: input, shape index: {}]   ;;  %s2186_s5 = inlined_call_operand.vmem [shape: f32[200,16], index: 5, kind: output, shape index: {}]  }
   0x1   :  { %s1524_s20 = smov 0  }
   0x2 LB: > { %s1533_s21 = sadd.s32 4294967295, %s1456_s20   ;;  %s1535_s22 = sadd.s32 1, %s1456_s20   ;;  %s1456_s20 = sphi %s1524_s20, %s2207_s20   ;;  %s1452_s19 = sphi %s1522_s19, %s2206_s19   ;;  %s1448_s18 = sphi %s1520_s18, %s2205_s18  }
   0x3   : > { %s129_s23 = ssub.s32 %s1456_s20, %s1535_s22  ;;  %s132_s24 = sadd.s32 1, %s1452_s19 }
   0x4   : > { %p130_p0 = scmp.eq.s32.totalorder %s129_s23, 0  ;;  %p142_p1 = scmp.ne.s32.totalorder %s1452_s19, %s1448_s18 }
   0x5   : > { %p143_p2 = scmp.eq.s32.totalorder %s1533_s21, 1  ;;  %p1189_p3 = scmp.ge.s32.totalorder %s1456_s20, 1 }
   0x6   : > { %s1543_s25 = scalar_select %p130_p0, %s1452_s19, %s132_s24  }
   0x7   : > { %p1545_p4 = por %p143_p2, %p142_p1  ;;  %p196_p5 = scmp.lt.s32.totalorder %s1456_s20, 3 }
   0x9   : > { %p197_p6 = pnand %p1189_p3, %p196_p5 }
   0xa   : > { %s1553_s29 = sshll.u32 (!%p197_p6), %s1533_s21, 4  ;;  %s224_s12 = sand.u32 (!%p197_p6), 1, %s1448_s18  }
   0xb   : > { %200 = sbr.rel (%p197_p6) target bundleno = 812 (0x32c), region = 40  ;;  %p232_p7 = scmp.lt.s32.totalorder (!%p197_p6), %s1553_s29, 24 }
   0xc   : > { %s1190_s13 = sshll.u32 (!%p197_p6), %s224_s12, 7 }
   0xd   : > { %s2022_s16 = scalar_lea.vmem (!%p197_p6), [#allocation2], %s1190_s13  }
  0x10   : > { %v1259_v0 = vld [vmem:[%s2182_s1 + $0x8] sm:$0xff]  ;;  %v1258_v1 = vld [vmem:[%s2182_s1] sm:$0xff]  ;;  %s233_s7 = scalar_select %p232_p7, %s1553_s29, 24  ;;  %vm289_vm0 = vcmask 261120   ;;  %v363_v26 = vlaneseq }
  0x11   : > { %320 = vmatpush.bf16.msra.mxu0 %v1259_v0  ;;  %1271 = vmatpush.bf16.msra.mxu3 %v1259_v0  ;;  %v1592_v27 = vld [vmem:[%s2183_s2] sm:$0x7]  ;;  %s918_s18 = ssub.s32 (%p1545_p4), 25, %s1553_s29  ;;  %s1268_s17 = sshll.u32 (%p1545_p4), %s1533_s21, 7 }
  0x12   : > { %s1192_s8 = sshll.u32 %s233_s7, 3  ;;  %v1594_v28 = vand.u32 127, %v363_v26  ;;  %v1597_v29 = vperm.slane %v1592_v27, 0  ;;  %p919_p8 = scmp.lt.s32.totalorder (%p1545_p4), %s918_s18, 16 }
  0x13   : > { %s1563_s11 = scalar_lea.vmem %s2181_s0, %s1192_s8  ;;  %s2084_s24 = scalar_lea.vmem (%p1545_p4), %s2186_s5, %s1268_s17  }
  0x14   : > { %v247_v2 = vld [vmem:[%s1563_s11] sm:$0xff]  ;;  %v248_v3 = vld [vmem:[%s1563_s11 + $0x8] sm:$0xff]  ;;  %v257_v4 = vld [vmem:[%s1563_s11 + $0x50] sm:$0xff]  ;;  %vm365_vm1 = vcmp.lt.s32.totalorder %v1594_v28, 64 }
  0x15   : > { %321 = vmatpush.bf16.msra.mxu0 %v1258_v1  ;;  %1272 = vmatpush.bf16.msra.mxu3 %v1258_v1  ;;  %v263_v5 = vpack.c.bf16 %v248_v3, %v247_v2  ;;  %v258_v6 = vld [vmem:[%s1563_s11 + $0x58] sm:$0xff]  ;;  %v249_v8 = vld [vmem:[%s1563_s11 + $0x10] sm:$0xff]  ;;  %v259_v10 = vld [vmem:[%s1563_s11 + $0x60] sm:$0xff] }
  0x16   : > { %v268_v7 = vpack.c.bf16 %v258_v6, %v257_v4  ;;  %v250_v9 = vld [vmem:[%s1563_s11 + $0x18] sm:$0xff]  ;;  %v260_v11 = vld [vmem:[%s1563_s11 + $0x68] sm:$0xff]  ;;  %v251_v14 = vld [vmem:[%s1563_s11 + $0x20] sm:$0xff] }
  0x17   : > { %v264_v12 = vpack.c.bf16 %v250_v9, %v249_v8  ;;  %v269_v13 = vpack.c.bf16 %v260_v11, %v259_v10  ;;  %v252_v15 = vld [vmem:[%s1563_s11 + $0x28] sm:$0xff]  ;;  %v261_v16 = vld [vmem:[%s1563_s11 + $0x70] sm:$0xff]  ;;  %v262_v17 = vld [vmem:[%s1563_s11 + $0x78] sm:$0xff] }
  0x18   : > { %1201 = vmatmul.msk.bf16.vlgmr.msra.gmra.mxu0 %vm289_vm0, %v263_v5  ;;  %1206 = vmatmul.msk.bf16.vlgmr.msra.gmra.mxu3 %vm289_vm0, %v268_v7  ;;  %v265_v18 = vpack.c.bf16 %v252_v15, %v251_v14  ;;  %v270_v19 = vpack.c.bf16 %v262_v17, %v261_v16  ;;  %v253_v20 = vld [vmem:[%s1563_s11 + $0x30] sm:$0xff]  ;;  %v254_v21 = vld [vmem:[%s1563_s11 + $0x38] sm:$0xff]  ;;  %v255_v23 = vld [vmem:[%s1563_s11 + $0x40] sm:$0xff] }
  0x19   : > { %v266_v22 = vpack.c.bf16 %v254_v21, %v253_v20  ;;  %v256_v24 = vld [vmem:[%s1563_s11 + $0x48] sm:$0xff] }
  0x1a   : > { %v267_v25 = vpack.c.bf16 %v256_v24, %v255_v23 }
  0x28   : > { %1202 = vmatmul.msk.bf16.gmra.mxu0 %vm289_vm0, %v264_v12  ;;  %1207 = vmatmul.msk.bf16.gmra.mxu3 %vm289_vm0, %v269_v13 }
  0x38   : > { %1203 = vmatmul.msk.bf16.gmra.mxu0 %vm289_vm0, %v265_v18  ;;  %1208 = vmatmul.msk.bf16.gmra.mxu3 %vm289_vm0, %v270_v19 }
  0x48   : > { %1204 = vmatmul.msk.bf16.gmra.mxu0 %vm289_vm0, %v266_v22 }
  0x58   : > { %1205 = vmatmul.msk.bf16.gmra.mxu0 %vm289_vm0, %v267_v25 }
  0x95   : > { %v323_v30 = vpop.f32.mrf.mxu0 }
  0x96   : > { %v324_v31 = vadd.f32 %v323_v30, %v1597_v29 }
  0x98   : > { %v366_v32 = vsel %vm365_vm1, %v324_v31, 0.0 }
  0x99   : > { %382 = vadd.xlane.f32.xlu1 %v366_v32 }
  0x9b   : > { %v348_v33 = vpop.f32.mrf.mxu3 }
  0x9c   : > { %v1604_v35 = vadd.f32 %v348_v33, %v1597_v29 }
  0x9d   : > { %v325_v34 = vpop.f32.mrf.mxu0 }
  0x9e   : > { %v1607_v36 = vadd.f32 %v325_v34, %v1597_v29  ;;  %v376_v37 = vsel %vm365_vm1, %v1604_v35, 0.0 }
  0x9f   : > { %402 = vadd.xlane.f32.xlu2 %v376_v37 }
  0xa0   : > { %v367_v38 = vsel %vm365_vm1, %v1607_v36, 0.0 }
  0xa1   : > { %384 = vadd.xlane.f32.xlu1 %v367_v38 }
  0xa3   : > { %v350_v39 = vpop.f32.mrf.mxu3 }
  0xa4   : > { %v1616_v41 = vadd.f32 %v350_v39, %v1597_v29 }
  0xa5   : > { %v328_v40 = vpop.f32.mrf.mxu0 }
  0xa6   : > { %v377_v42 = vsel %vm365_vm1, %v1616_v41, 0.0  ;;  %v1654_v3 = vadd.f32 %v328_v40, %v1597_v29 }
  0xa7   : > { %404 = vadd.xlane.f32.xlu2 %v377_v42 }
  0xa8   : > { %v368_v4 = vsel %vm365_vm1, %v1654_v3, 0.0 }
  0xab   : > { %v353_v43 = vpop.f32.mrf.mxu3 }
  0xac   : > { %v1622_v45 = vadd.f32 %v353_v43, %v1597_v29 }
  0xad   : > { %v330_v44 = vpop.f32.mrf.mxu0 }
  0xae   : > { %v331_v46 = vadd.f32 %v330_v44, %v1597_v29  ;;  %v378_v47 = vsel %vm365_vm1, %v1622_v45, 0.0 }
  0xaf   : > { %406 = vadd.xlane.f32.xlu2 %v378_v47 }
  0xb0   : > { %v369_v48 = vsel %vm365_vm1, %v331_v46, 0.0 }
  0xb1   : > { %388 = vadd.xlane.f32.xlu1 %v369_v48 }
  0xb3   : > { %v355_v50 = vpop.f32.mrf.mxu3 }
  0xb4   : > { %v1660_v5 = vadd.f32 %v355_v50, %v1597_v29 }
  0xb5   : > { %v333_v49 = vpop.f32.mrf.mxu0 }
  0xb6   : > { %v334_v51 = vadd.f32 %v333_v49, %v1597_v29  ;;  %v379_v6 = vsel %vm365_vm1, %v1660_v5, 0.0 }
  0xb8   : > { %v370_v52 = vsel %vm365_vm1, %v334_v51, 0.0 }
  0xb9   : > { %390 = vadd.xlane.f32.xlu1 %v370_v52 }
  0xbb   : > { %v358_v55 = vpop.f32.mrf.mxu3 }
  0xbc   : > { %v1640_v57 = vadd.f32 %v358_v55, %v1597_v29 }
  0xbd   : > { %v335_v53 = vpop.f32.mrf.mxu0 }
  0xbe   : > { %v1634_v54 = vadd.f32 %v335_v53, %v1597_v29  ;;  %v380_v59 = vsel %vm365_vm1, %v1640_v57, 0.0 }
  0xc0   : > { %v371_v56 = vsel %vm365_vm1, %v1634_v54, 0.0 }
  0xc1   : > { %392 = vadd.xlane.f32.xlu2 %v371_v56 }
  0xc3   : > { %v360_v7 = vpop.f32.mrf.mxu3 }
  0xc4   : > { %v1666_v8 = vadd.f32 %v360_v7, %v1597_v29 }
  0xc5   : > { %v338_v58 = vpop.f32.mrf.mxu0 }
  0xc6   : > { %v381_v9 = vsel %vm365_vm1, %v1666_v8, 0.0  ;;  %v1710_v48 = vadd.f32 %v338_v58, %v1597_v29 }
  0xc8   : > { %v372_v56 = vsel %vm365_vm1, %v1710_v48, 0.0 }
  0xc9   : > { %410 = vadd.xlane.f32.xlu2 %v380_v59 }
  0xcd   : > { %v1645_v60 = vpop.f32.mrf.mxu0 }
  0xce   : > { %v1724_v58 = vadd.f32 %v1645_v60, %v1597_v29 }
  0xd5   : > { %v343_v61 = vpop.f32.mrf.mxu0 }
  0xd6   : > { %v344_v62 = vadd.f32 %v343_v61, %v1597_v29 }
  0xd8   : > { %v374_v63 = vsel %vm365_vm1, %v344_v62, 0.0 }
  0xd9   : > { %398 = vadd.xlane.f32.xlu0 %v374_v63 }
  0xdd   : > { %v345_v0 = vpop.f32.mrf.mxu0 }
  0xde   : > { %v346_v1 = vadd.f32 %v345_v0, %v1597_v29 }
  0xe0   : > { %v375_v2 = vsel %vm365_vm1, %v346_v1, 0.0 }
  0xe1   : > { %400 = vadd.xlane.f32.xlu0 %v375_v2  ;;  %v373_v2 = vsel %vm365_vm1, %v1724_v58, 0.0 }
  0xe9   : > { %386 = vadd.xlane.f32.xlu0 %v368_v4 }
  0xf1   : > { %408 = vadd.xlane.f32.xlu0 %v379_v6 }
  0xf9   : > { %412 = vadd.xlane.f32.xlu0 %v381_v9 }
 0x10c   : > { %v383_v10 = vpop.xlane.xlu1 %382 }
 0x10d   : > { %v414_v11 = vmul.f32 0.015625, %v383_v10 }
 0x10f   : > { %v430_v12 = vsub.f32 %v324_v31, %v414_v11 }
 0x111   : > { %v1673_v13 = vsel %vm365_vm1, %v430_v12, 0.0 }
 0x112   : > { %v462_v14 = vmul.f32 %v1673_v13, %v1673_v13  ;;  %v403_v15 = vpop.xlane.xlu2 %402 }
 0x113   : > { %v424_v18 = vmul.f32 0.015625, %v403_v15 }
 0x114   : > { %478 = vadd.xlane.f32.xlu1 %v462_v14  ;;  %v385_v16 = vpop.xlane.xlu1 %384 }
 0x115   : > { %v415_v17 = vmul.f32 0.015625, %v385_v16  ;;  %v440_v20 = vsub.f32 %v1604_v35, %v424_v18 }
 0x117   : > { %v431_v19 = vsub.f32 %v1607_v36, %v415_v17  ;;  %v1687_v23 = vsel %vm365_vm1, %v440_v20, 0.0 }
 0x118   : > { %v472_v24 = vmul.f32 %v1687_v23, %v1687_v23 }
 0x119   : > { %v1681_v21 = vsel %vm365_vm1, %v431_v19, 0.0 }
 0x11a   : > { %v463_v22 = vmul.f32 %v1681_v21, %v1681_v21  ;;  %v405_v42 = vpop.xlane.xlu2 %404 }
 0x11b   : > { %v425_v49 = vmul.f32 0.015625, %v405_v42 }
 0x11c   : > { %480 = vadd.xlane.f32.xlu2 %v463_v22 }
 0x11d   : > { %v441_v55 = vsub.f32 %v1616_v41, %v425_v49 }
 0x11f   : > { %v1728_v63 = vsel %vm365_vm1, %v441_v55, 0.0 }
 0x120   : > { %v473_v41 = vmul.f32 %v1728_v63, %v1728_v63 }
 0x122   : > { %v407_v52 = vpop.xlane.xlu2 %406 }
 0x123   : > { %v426_v61 = vmul.f32 0.015625, %v407_v52 }
 0x124   : > { %498 = vadd.xlane.f32.xlu2 %v472_v24  ;;  %v389_v25 = vpop.xlane.xlu1 %388 }
 0x125   : > { %v417_v26 = vmul.f32 0.015625, %v389_v25  ;;  %v442_v0 = vsub.f32 %v1622_v45, %v426_v61  ;;  %v1266_v25 = vld [vmem:[%s2184_s3 + $0x30] sm:$0xff] }
 0x127   : > { %v433_v30 = vsub.f32 %v331_v46, %v417_v26  ;;  %v1739_v7 = vsel %vm365_vm1, %v442_v0, 0.0  ;;  %v1802_v0 = vperm.slane %v1592_v27, 1 }
 0x128   : > { %v474_v45 = vmul.f32 %v1739_v7, %v1739_v7 }
 0x129   : > { %v1693_v31 = vsel %vm365_vm1, %v433_v30, 0.0  ;;  %v1265_v30 = vld [vmem:[%s2184_s3 + $0x28] sm:$0xff] }
 0x12a   : > { %v465_v32 = vmul.f32 %v1693_v31, %v1693_v31 }
 0x12c   : > { %484 = vadd.xlane.f32.xlu2 %v465_v32  ;;  %v391_v33 = vpop.xlane.xlu1 %390  ;;  %v1264_v32 = vld [vmem:[%s2184_s3 + $0x20] sm:$0xff] }
 0x12d   : > { %v418_v34 = vmul.f32 0.015625, %v391_v33  ;;  %v1263_v33 = vld [vmem:[%s2184_s3 + $0x18] sm:$0xff] }
 0x12f   : > { %v434_v35 = vsub.f32 %v334_v51, %v418_v34  ;;  %v1262_v34 = vld [vmem:[%s2184_s3 + $0x10] sm:$0xff] }
 0x131   : > { %v1699_v36 = vsel %vm365_vm1, %v434_v35, 0.0 }
 0x132   : > { %v466_v37 = vmul.f32 %v1699_v36, %v1699_v36 }
 0x134   : > { %486 = vadd.xlane.f32.xlu2 %v466_v37  ;;  %v393_v4 = vpop.xlane.xlu2 %392 }
 0x135   : > { %v419_v60 = vmul.f32 0.015625, %v393_v4 }
 0x137   : > { %v435_v10 = vsub.f32 %v1634_v54, %v419_v60  ;;  %v1267_v54 = vld [vmem:[%s2184_s3 + $0x38] sm:$0xff]  ;;  %v1807_v60 = vperm.slane %v1592_v27, 2 }
 0x138   : > { %844 = vmatpush.bf16.msra.mxu1 %v1267_v54  ;;  %1273 = vmatpush.bf16.msra.mxu2 %v1267_v54 }
 0x139   : > { %v1754_v18 = vsel %vm365_vm1, %v435_v10, 0.0 }
 0x13a   : > { %v467_v20 = vmul.f32 %v1754_v18, %v1754_v18 }
 0x13c   : > { %v411_v12 = vpop.xlane.xlu2 %410  ;;  %845 = vmatpush.bf16.msra.mxu1 %v1266_v25  ;;  %1274 = vmatpush.bf16.msra.mxu2 %v1266_v25 }
 0x13d   : > { %v428_v16 = vmul.f32 0.015625, %v411_v12 }
 0x13f   : > { %v444_v24 = vsub.f32 %v1640_v57, %v428_v16 }
 0x140   : > { %846 = vmatpush.bf16.msra.mxu1 %v1265_v30  ;;  %1275 = vmatpush.bf16.msra.mxu2 %v1265_v30 }
 0x141   : > { %v1779_v26 = vsel %vm365_vm1, %v444_v24, 0.0 }
 0x142   : > { %v476_v57 = vmul.f32 %v1779_v26, %v1779_v26 }
 0x144   : > { %847 = vmatpush.bf16.msra.mxu1 %v1264_v32  ;;  %1276 = vmatpush.bf16.msra.mxu2 %v1264_v32 }
 0x148   : > { %848 = vmatpush.bf16.msra.mxu1 %v1263_v33  ;;  %1277 = vmatpush.bf16.msra.mxu2 %v1263_v33 }
 0x14c   : > { %v399_v38 = vpop.xlane.xlu0 %398  ;;  %849 = vmatpush.bf16.msra.mxu1 %v1262_v34  ;;  %1278 = vmatpush.bf16.msra.mxu2 %v1262_v34 }
 0x14d   : > { %v422_v39 = vmul.f32 0.015625, %v399_v38  ;;  %v1261_v38 = vld [vmem:[%s2184_s3 + $0x8] sm:$0xff] }
 0x14f   : > { %v438_v40 = vsub.f32 %v344_v62, %v422_v39 }
 0x150   : > { %850 = vmatpush.bf16.msra.mxu1 %v1261_v38  ;;  %1279 = vmatpush.bf16.msra.mxu2 %v1261_v38 }
 0x151   : > { %v1705_v43 = vsel %vm365_vm1, %v438_v40, 0.0  ;;  %v1260_v40 = vld [vmem:[%s2184_s3] sm:$0xff] }
 0x152   : > { %v470_v44 = vmul.f32 %v1705_v43, %v1705_v43 }
 0x154   : > { %v401_v46 = vpop.xlane.xlu0 %400  ;;  %494 = vadd.xlane.f32.xlu0 %v470_v44  ;;  %851 = vmatpush.bf16.msra.mxu1 %v1260_v40 }
 0x155   : > { %v423_v47 = vmul.f32 0.015625, %v401_v46  ;;  %1280 = vmatpush.bf16.msra.mxu2 %v1260_v40 }
 0x157   : > { %v439_v50 = vsub.f32 %v346_v1, %v423_v47 }
 0x159   : > { %v1714_v51 = vsel %vm365_vm1, %v439_v50, 0.0 }
 0x15a   : > { %v471_v53 = vmul.f32 %v1714_v51, %v1714_v51 }
 0x15c   : > { %394 = vadd.xlane.f32.xlu0 %v372_v56  ;;  %v387_v59 = vpop.xlane.xlu0 %386  ;;  %496 = vadd.xlane.f32.xlu1 %v471_v53 }
 0x15d   : > { %v416_v62 = vmul.f32 0.015625, %v387_v59 }
 0x15f   : > { %v432_v1 = vsub.f32 %v1654_v3, %v416_v62 }
 0x161   : > { %v1743_v9 = vsel %vm365_vm1, %v432_v1, 0.0 }
 0x162   : > { %v464_v3 = vmul.f32 %v1743_v9, %v1743_v9 }
 0x164   : > { %500 = vadd.xlane.f32.xlu0 %v473_v41  ;;  %v409_v29 = vpop.xlane.xlu0 %408  ;;  %396 = vadd.xlane.f32.xlu1 %v373_v2 }
 0x165   : > { %v427_v6 = vmul.f32 0.015625, %v409_v29 }
 0x167   : > { %v443_v11 = vsub.f32 %v1660_v5, %v427_v6 }
 0x169   : > { %v1758_v19 = vsel %vm365_vm1, %v443_v11, 0.0 }
 0x16c   : > { %502 = vadd.xlane.f32.xlu0 %v474_v45  ;;  %v413_v14 = vpop.xlane.xlu0 %412  ;;  %482 = vadd.xlane.f32.xlu1 %v464_v3 }
 0x16d   : > { %v429_v15 = vmul.f32 0.015625, %v413_v14 }
 0x16f   : > { %v445_v17 = vsub.f32 %v1666_v8, %v429_v15  ;;  %v475_v8 = vmul.f32 %v1758_v19, %v1758_v19 }
 0x171   : > { %v1765_v5 = vsel %vm365_vm1, %v445_v17, 0.0 }
 0x172   : > { %v477_v22 = vmul.f32 %v1765_v5, %v1765_v5 }
 0x174   : > { %488 = vadd.xlane.f32.xlu0 %v467_v20  ;;  %504 = vadd.xlane.f32.xlu1 %v475_v8 }
 0x175   : > { %508 = vadd.xlane.f32.xlu2 %v477_v22 }
 0x17c   : > { %506 = vadd.xlane.f32.xlu1 %v476_v57 }
 0x187   : > { %v479_v35 = vpop.xlane.xlu1 %478 }
 0x188   : > { %v510_v37 = vmul.f32 0.015625, %v479_v35 }
 0x18a   : > { %v526_v39 = vadd.f32 1e-05, %v510_v37 }
 0x18c   : > { %1370 = vrsqrt.f32 %v526_v39  ;;  %vm548_vm3 = vweird.f32 %v526_v39 }
 0x18f   : > { %v481_v42 = vpop.xlane.xlu2 %480 }
 0x190   : > { %v511_v44 = vmul.f32 0.015625, %v481_v42 }
 0x192   : > { %v1371_v46 = vpop.eup %1370  ;;  %v527_v47 = vadd.f32 1e-05, %v511_v44 }
 0x193   : > { %v543_v49 = vmul.f32 %v1371_v46, %v526_v39  ;;  %vm549_vm2 = vweird.f32 %v1371_v46 }
 0x194   : > { %1372 = vrsqrt.f32 %v527_v47  ;;  %vm550_vm4 = vmor %vm548_vm3, %vm549_vm2  ;;  %vm558_vm6 = vweird.f32 %v527_v47 }
 0x195   : > { %v544_v50 = vmul.f32 %v1371_v46, %v543_v49 }
 0x197   : > { %v545_v52 = vmul.f32 0.5, %v544_v50  ;;  %v499_v15 = vpop.xlane.xlu2 %498 }
 0x198   : > { %v520_v17 = vmul.f32 0.015625, %v499_v15 }
 0x199   : > { %v546_v53 = vsub.f32 1.5, %v545_v52 }
 0x19a   : > { %v1373_v55 = vpop.eup %1372  ;;  %v1813_v8 = vadd.f32 1e-05, %v520_v17 }
 0x19b   : > { %v547_v56 = vmul.f32 %v1371_v46, %v546_v53  ;;  %v553_v59 = vmul.f32 %v1373_v55, %v527_v47  ;;  %vm559_vm5 = vweird.f32 %v1373_v55 }
 0x19c   : > { %vm560_vm7 = vmor %vm558_vm6, %vm559_vm5  ;;  %vm648_vm14 = vweird.f32 %v1813_v8 }
 0x19d   : > { %v551_v61 = vsel %vm550_vm4, %v1371_v46, %v547_v56  ;;  %v554_v62 = vmul.f32 %v1373_v55, %v553_v59 }
 0x19e   : > { %v702_v1 = vmul.f32 %v551_v61, %v1673_v13 }
 0x19f   : > { %v555_v41 = vmul.f32 0.5, %v554_v62  ;;  %v485_v16 = vpop.xlane.xlu2 %484 }
 0x1a0   : > { %v719_v29 = vmul.f32 %v1802_v0, %v702_v1  ;;  %v513_v54 = vmul.f32 0.015625, %v485_v16 }
 0x1a1   : > { %v556_v2 = vsub.f32 1.5, %v555_v41 }
 0x1a2   : > { %v736_v10 = vadd.f32 %v1807_v60, %v719_v29 }
 0x1a3   : > { %v557_v4 = vmul.f32 %v1373_v55, %v556_v2 }
 0x1a4   : > { %v752_v13 = vmax.f32 %v736_v10, 0.0 }
 0x1a5   : > { %v561_v6 = vsel %vm560_vm7, %v1373_v55, %v557_v4 }
 0x1a6   : > { %v703_v45 = vmul.f32 %v561_v6, %v1681_v21  ;;  %v1815_v21 = vadd.f32 1e-05, %v513_v54 }
 0x1a7   : > { %v487_v35 = vpop.xlane.xlu2 %486 }
 0x1a8   : > { %v720_v3 = vmul.f32 %v1802_v0, %v703_v45  ;;  %v514_v46 = vmul.f32 0.015625, %v487_v35  ;;  %vm578_vm3 = vweird.f32 %v1815_v21 }
 0x1aa   : > { %v737_v11 = vadd.f32 %v1807_v60, %v720_v3  ;;  %v1834_v61 = vadd.f32 1e-05, %v514_v46 }
 0x1ac   : > { %v753_v12 = vmax.f32 %v737_v11, 0.0 }
 0x1ae   : > { %v768_v14 = vpack.c.bf16 %v753_v12, %v752_v13 }
 0x1b0   : > { %852 = vmatmul.bf16.vlgmr.msra.gmra.mxu1 %v768_v14 }
 0x1c7   : > { %v495_v20 = vpop.xlane.xlu0 %494 }
 0x1c8   : > { %v518_v27 = vmul.f32 0.015625, %v495_v20 }
 0x1ca   : > { %v534_v22 = vadd.f32 1e-05, %v518_v27 }
 0x1cc   : > { %1374 = vrsqrt.f32 %v534_v22  ;;  %vm628_vm9 = vweird.f32 %v534_v22 }
 0x1cd   : > { %1376 = vrsqrt.f32 %v1813_v8 }
 0x1ce   : > { %1378 = vrsqrt.f32 %v1815_v21 }
 0x1cf   : > { %v395_v24 = vpop.xlane.xlu0 %394  ;;  %v497_v25 = vpop.xlane.xlu1 %496 }
 0x1d0   : > { %v420_v30 = vmul.f32 0.015625, %v395_v24  ;;  %v519_v57 = vmul.f32 0.015625, %v497_v25 }
 0x1d2   : > { %v1375_v32 = vpop.eup %1374  ;;  %v436_v33 = vsub.f32 %v1710_v48, %v420_v30  ;;  %v535_v34 = vadd.f32 1e-05, %v519_v57 }
 0x1d3   : > { %v623_v37 = vmul.f32 %v1375_v32, %v534_v22  ;;  %v1820_v38 = vpop.eup %1376  ;;  %vm629_vm8 = vweird.f32 %v1375_v32 }
 0x1d4   : > { %1380 = vrsqrt.f32 %v535_v34  ;;  %v1824_v39 = vsel %vm365_vm1, %v436_v33, 0.0  ;;  %v1826_v40 = vpop.eup %1378  ;;  %v643_v48 = vmul.f32 %v1820_v38, %v1813_v8  ;;  %vm630_vm10 = vmor %vm628_vm9, %vm629_vm8  ;;  %vm638_vm12 = vweird.f32 %v535_v34 }
 0x1d5   : > { %v624_v42 = vmul.f32 %v1375_v32, %v623_v37  ;;  %v468_v44 = vmul.f32 %v1824_v39, %v1824_v39  ;;  %v573_v52 = vmul.f32 %v1826_v40, %v1815_v21  ;;  %vm649_vm15 = vweird.f32 %v1820_v38 }
 0x1d6   : > { %v644_v1 = vmul.f32 %v1820_v38, %v643_v48  ;;  %vm579_vm0 = vweird.f32 %v1826_v40  ;;  %vm1881_vm2 = vmor %vm648_vm14, %vm649_vm15 }
 0x1d7   : > { %v625_v47 = vmul.f32 0.5, %v624_v42  ;;  %490 = vadd.xlane.f32.xlu0 %v468_v44  ;;  %v501_v49 = vpop.xlane.xlu0 %500  ;;  %v397_v50 = vpop.xlane.xlu1 %396  ;;  %v574_v29 = vmul.f32 %v1826_v40, %v573_v52  ;;  %vm1893_vm4 = vmor %vm578_vm3, %vm579_vm0 }
 0x1d8   : > { %v521_v53 = vmul.f32 0.015625, %v501_v49  ;;  %v421_v55 = vmul.f32 0.015625, %v397_v50  ;;  %v645_v10 = vmul.f32 0.5, %v644_v1 }
 0x1d9   : > { %v626_v56 = vsub.f32 1.5, %v625_v47  ;;  %v575_v14 = vmul.f32 0.5, %v574_v29 }
 0x1da   : > { %v1381_v59 = vpop.eup %1380  ;;  %v1836_v62 = vadd.f32 1e-05, %v521_v53  ;;  %v437_v41 = vsub.f32 %v1724_v58, %v421_v55  ;;  %v646_v22 = vsub.f32 1.5, %v645_v10 }
 0x1db   : > { %v627_v2 = vmul.f32 %v1375_v32, %v626_v56  ;;  %v633_v4 = vmul.f32 %v1381_v59, %v535_v34  ;;  %vm639_vm11 = vweird.f32 %v1381_v59  ;;  %v576_v57 = vsub.f32 1.5, %v575_v14 }
 0x1dc   : > { %1382 = vrsqrt.f32 %v1836_v62  ;;  %v1844_v6 = vsel %vm365_vm1, %v437_v41, 0.0  ;;  %vm640_vm13 = vmor %vm638_vm12, %vm639_vm11  ;;  %v647_v35 = vmul.f32 %v1820_v38, %v646_v22  ;;  %vm658_vm5 = vweird.f32 %v1836_v62 }
 0x1dd   : > { %v634_v45 = vmul.f32 %v1381_v59, %v633_v4  ;;  %v469_v3 = vmul.f32 %v1844_v6, %v1844_v6  ;;  %1384 = vrsqrt.f32 %v1834_v61  ;;  %v631_v58 = vsel %vm630_vm10, %v1375_v32, %v627_v2 }
 0x1de   : > { %v710_v28 = vmul.f32 %v631_v58, %v1705_v43  ;;  %v577_v48 = vmul.f32 %v1826_v40, %v576_v57  ;;  %vm588_vm10 = vweird.f32 %v1834_v61 }
 0x1df   : > { %v635_v11 = vmul.f32 0.5, %v634_v45  ;;  %v503_v13 = vpop.xlane.xlu0 %502  ;;  %492 = vadd.xlane.f32.xlu1 %v469_v3  ;;  %v483_v12 = vpop.xlane.xlu1 %482  ;;  %v651_v3 = vsel %vm1881_vm2, %v1820_v38, %v647_v35 }
 0x1e0   : > { %v522_v15 = vmul.f32 0.015625, %v503_v13  ;;  %v512_v16 = vmul.f32 0.015625, %v483_v12  ;;  %v727_v33 = vmul.f32 %v1802_v0, %v710_v28  ;;  %v581_v58 = vsel %vm1893_vm4, %v1826_v40, %v577_v48 }
 0x1e1   : > { %v636_v17 = vsub.f32 1.5, %v635_v11  ;;  %v712_v28 = vmul.f32 %v651_v3, %v1687_v23 }
 0x1e2   : > { %v1850_v54 = vpop.eup %1382  ;;  %v1852_v20 = vadd.f32 1e-05, %v522_v15  ;;  %v1854_v27 = vadd.f32 1e-05, %v512_v16  ;;  %v744_v55 = vadd.f32 %v1807_v60, %v727_v33 }
 0x1e3   : > { %v637_v24 = vmul.f32 %v1381_v59, %v636_v17  ;;  %v653_v25 = vmul.f32 %v1850_v54, %v1836_v62  ;;  %v1858_v30 = vpop.eup %1384  ;;  %vm659_vm1 = vweird.f32 %v1850_v54  ;;  %v705_v17 = vmul.f32 %v581_v58, %v1693_v31 }
 0x1e4   : > { %1386 = vrsqrt.f32 %v1852_v20  ;;  %v583_v37 = vmul.f32 %v1858_v30, %v1834_v61  ;;  %vm1910_vm6 = vmor %vm658_vm5, %vm659_vm1  ;;  %v760_v38 = vmax.f32 %v744_v55, 0.0  ;;  %v729_v35 = vmul.f32 %v1802_v0, %v712_v28 }
 0x1e5   : > { %v641_v32 = vsel %vm640_vm13, %v1381_v59, %v637_v24  ;;  %v654_v43 = vmul.f32 %v1850_v54, %v653_v25  ;;  %1388 = vrsqrt.f32 %v1854_v27  ;;  %v722_v23 = vmul.f32 %v1802_v0, %v705_v17 }
 0x1e6   : > { %v711_v34 = vmul.f32 %v641_v32, %v1714_v51  ;;  %v584_v8 = vmul.f32 %v1858_v30, %v583_v37  ;;  %vm568_vm8 = vweird.f32 %v1854_v27  ;;  %vm589_vm11 = vweird.f32 %v1858_v30 }
 0x1e7   : > { %v655_v42 = vmul.f32 0.5, %v654_v43  ;;  %v489_v44 = vpop.xlane.xlu0 %488  ;;  %v505_v46 = vpop.xlane.xlu1 %504  ;;  %v739_v55 = vadd.f32 %v1807_v60, %v722_v23  ;;  %vm1960_vm15 = vmor %vm588_vm10, %vm589_vm11  ;;  %vm668_vm1 = vweird.f32 %v1852_v20 }
 0x1e8   : > { %v515_v47 = vmul.f32 0.015625, %v489_v44  ;;  %v509_v49 = vpop.xlane.xlu2 %508  ;;  %v523_v50 = vmul.f32 0.015625, %v505_v46  ;;  %v728_v52 = vmul.f32 %v1802_v0, %v711_v34  ;;  %v585_v15 = vmul.f32 0.5, %v584_v8 }
 0x1e9   : > { %v656_v53 = vsub.f32 1.5, %v655_v42  ;;  %v525_v51 = vmul.f32 0.015625, %v509_v49 }
 0x1ea   : > { %v1875_v56 = vpop.eup %1386  ;;  %v1886_v41 = vadd.f32 1e-05, %v515_v47  ;;  %v1888_v1 = vadd.f32 1e-05, %v523_v50  ;;  %v745_v2 = vadd.f32 %v1807_v60, %v728_v52  ;;  %v586_v34 = vsub.f32 1.5, %v585_v15 }
 0x1eb   : > { %v1389_v4 = vpop.eup %1388  ;;  %v657_v45 = vmul.f32 %v1850_v54, %v656_v53  ;;  %v663_v21 = vmul.f32 %v1875_v56, %v1852_v20  ;;  %v1919_v13 = vadd.f32 1e-05, %v525_v51  ;;  %vm669_vm13 = vweird.f32 %v1875_v56 }
 0x1ec   : > { %v563_v11 = vmul.f32 %v1389_v4, %v1854_v27  ;;  %1390 = vrsqrt.f32 %v1886_v41  ;;  %v761_v14 = vmax.f32 %v745_v2, 0.0  ;;  %vm569_vm7 = vweird.f32 %v1389_v4  ;;  %vm1973_vm3 = vmor %vm668_vm1, %vm669_vm13 }
 0x1ed   : > { %v661_v62 = vsel %vm1910_vm6, %v1850_v54, %v657_v45  ;;  %v664_v12 = vmul.f32 %v1875_v56, %v663_v21  ;;  %1392 = vrsqrt.f32 %v1888_v1  ;;  %vm570_vm9 = vmor %vm568_vm8, %vm569_vm7  ;;  %v746_v27 = vadd.f32 %v1807_v60, %v729_v35 }
 0x1ee   : > { %v564_v40 = vmul.f32 %v1389_v4, %v563_v11  ;;  %v772_v25 = vpack.c.bf16 %v761_v14, %v760_v38  ;;  %v713_v54 = vmul.f32 %v661_v62, %v1728_v63  ;;  %1394 = vrsqrt.f32 %v1919_v13 }
 0x1ef   : > { %v507_v16 = vpop.xlane.xlu1 %506  ;;  %v665_v32 = vmul.f32 0.5, %v664_v12  ;;  %v587_v51 = vmul.f32 %v1858_v30, %v586_v34  ;;  %vm598_vm14 = vweird.f32 %v1886_v41  ;;  %vm678_vm4 = vweird.f32 %v1888_v1 }
 0x1f0   : > { %v565_v22 = vmul.f32 0.5, %v564_v40  ;;  %v524_v24 = vmul.f32 0.015625, %v507_v16  ;;  %872 = vmatmul.bf16.vlgmr.msra.gmra.mxu2 %v772_v25  ;;  %v730_v42 = vmul.f32 %v1802_v0, %v713_v54  ;;  %v755_v14 = vmax.f32 %v739_v55, 0.0 }
 0x1f1   : > { %v666_v48 = vsub.f32 1.5, %v665_v32  ;;  %v762_v15 = vmax.f32 %v746_v27, 0.0  ;;  %v591_v16 = vsel %vm1960_vm15, %v1858_v30, %v587_v51  ;;  %vm698_vm10 = vweird.f32 %v1919_v13 }
 0x1f2   : > { %v1927_v57 = vpop.eup %1390  ;;  %v566_v43 = vsub.f32 1.5, %v565_v22  ;;  %v1929_v33 = vadd.f32 1e-05, %v524_v24  ;;  %v747_v59 = vadd.f32 %v1807_v60, %v730_v42  ;;  %v706_v32 = vmul.f32 %v591_v16, %v1699_v36 }
 0x1f3   : > { %v593_v31 = vmul.f32 %v1927_v57, %v1886_v41  ;;  %v1393_v37 = vpop.eup %1392  ;;  %vm599_vm12 = vweird.f32 %v1927_v57 }
 0x1f4   : > { %v567_v63 = vmul.f32 %v1389_v4, %v566_v43  ;;  %1396 = vrsqrt.f32 %v1929_v33  ;;  %v673_v46 = vmul.f32 %v1393_v37, %v1888_v1  ;;  %v1941_v49 = vpop.eup %1394  ;;  %vm679_vm0 = vweird.f32 %v1393_v37  ;;  %vm1968_vm2 = vmor %vm598_vm14, %vm599_vm12 }
 0x1f5   : > { %v594_v44 = vmul.f32 %v1927_v57, %v593_v31  ;;  %v693_v45 = vmul.f32 %v1941_v49, %v1919_v13  ;;  %v763_v61 = vmax.f32 %v747_v59, 0.0  ;;  %vm680_vm5 = vmor %vm678_vm4, %vm679_vm0  ;;  %v723_v23 = vmul.f32 %v1802_v0, %v706_v32 }
 0x1f6   : > { %v571_v47 = vsel %vm570_vm9, %v1389_v4, %v567_v63  ;;  %v674_v52 = vmul.f32 %v1393_v37, %v673_v46  ;;  %vm699_vm7 = vweird.f32 %v1941_v49  ;;  %vm688_vm8 = vweird.f32 %v1929_v33 }
 0x1f7   : > { %v595_v50 = vmul.f32 0.5, %v594_v44  ;;  %v704_v53 = vmul.f32 %v571_v47, %v1743_v9  ;;  %v667_v9 = vmul.f32 %v1875_v56, %v666_v48  ;;  %v694_v28 = vmul.f32 %v1941_v49, %v693_v45  ;;  %vm700_vm11 = vmor %vm698_vm10, %vm699_vm7 }
 0x1f8   : > { %v675_v4 = vmul.f32 0.5, %v674_v52  ;;  %v773_v25 = vpack.c.bf16 %v763_v61, %v762_v15  ;;  %v740_v36 = vadd.f32 %v1807_v60, %v723_v23  ;;  %vm893_vm12 = vcmask 130048  }
 0x1f9   : > { %v596_v2 = vsub.f32 1.5, %v595_v50  ;;  %v721_v29 = vmul.f32 %v1802_v0, %v704_v53  ;;  %v671_v17 = vsel %vm1973_vm3, %v1875_v56, %v667_v9  ;;  %v695_v43 = vmul.f32 0.5, %v694_v28 }
 0x1fa   : > { %v1951_v8 = vpop.eup %1396  ;;  %v676_v58 = vsub.f32 1.5, %v675_v4  ;;  %v714_v30 = vmul.f32 %v671_v17, %v1739_v7  ;;  %v756_v47 = vmax.f32 %v740_v36, 0.0 }
 0x1fb   : > { %v597_v3 = vmul.f32 %v1927_v57, %v596_v2  ;;  %v683_v10 = vmul.f32 %v1951_v8, %v1929_v33  ;;  %v738_v11 = vadd.f32 %v1807_v60, %v721_v29  ;;  %vm689_vm6 = vweird.f32 %v1951_v8 }
 0x1fc   : > { %v677_v12 = vmul.f32 %v1393_v37, %v676_v58  ;;  %v731_v35 = vmul.f32 %v1802_v0, %v714_v30  ;;  %vm690_vm9 = vmor %vm688_vm8, %vm689_vm6 }
 0x1fd   : > { %v601_v38 = vsel %vm1968_vm2, %v1927_v57, %v597_v3  ;;  %v684_v20 = vmul.f32 %v1951_v8, %v683_v10  ;;  %v754_v40 = vmax.f32 %v738_v11, 0.0 }
 0x1fe   : > { %v681_v22 = vsel %vm680_vm5, %v1393_v37, %v677_v12  ;;  %v707_v1 = vmul.f32 %v601_v38, %v1754_v18  ;;  %v696_v18 = vsub.f32 1.5, %v695_v43  ;;  %v748_v7 = vadd.f32 %v1807_v60, %v731_v35 }
 0x1ff   : > { %v769_v24 = vpack.c.bf16 %v755_v14, %v754_v40  ;;  %v715_v54 = vmul.f32 %v681_v22, %v1758_v19  ;;  %v685_v57 = vmul.f32 0.5, %v684_v20 }
 0x200   : > { %877 = vmatmul.bf16.gmra.mxu2 %v773_v25  ;;  %v724_v34 = vmul.f32 %v1802_v0, %v707_v1  ;;  %v697_v42 = vmul.f32 %v1941_v49, %v696_v18  ;;  %v764_v50 = vmax.f32 %v748_v7, 0.0 }
 0x201   : > { %857 = vmatmul.bf16.gmra.mxu1 %v769_v24  ;;  %v732_v56 = vmul.f32 %v1802_v0, %v715_v54  ;;  %v686_v31 = vsub.f32 1.5, %v685_v57 }
 0x202   : > { %v741_v19 = vadd.f32 %v1807_v60, %v724_v34  ;;  %v701_v52 = vsel %vm700_vm11, %v1941_v49, %v697_v42 }
 0x203   : > { %v749_v37 = vadd.f32 %v1807_v60, %v732_v56  ;;  %v687_v63 = vmul.f32 %v1951_v8, %v686_v31  ;;  %v717_v33 = vmul.f32 %v701_v52, %v1765_v5 }
 0x204   : > { %v757_v44 = vmax.f32 %v741_v19, 0.0 }
 0x205   : > { %v765_v46 = vmax.f32 %v749_v37, 0.0  ;;  %v691_v48 = vsel %vm690_vm9, %v1951_v8, %v687_v63  ;;  %v734_v13 = vmul.f32 %v1802_v0, %v717_v33 }
 0x206   : > { %v770_v53 = vpack.c.bf16 %v757_v44, %v756_v47  ;;  %v716_v51 = vmul.f32 %v691_v48, %v1779_v26  ;;  %v2019_v26 = vld [vmem:[%s2185_s4] ss:$0 sm:$0xff] }
 0x207   : > { %v774_v27 = vpack.c.bf16 %v765_v46, %v764_v50  ;;  %v751_v2 = vadd.f32 %v1807_v60, %v734_v13 }
 0x208   : > { %v733_v55 = vmul.f32 %v1802_v0, %v716_v51 }
 0x209   : > { %v767_v29 = vmax.f32 %v751_v2, 0.0 }
 0x20a   : > { %v750_v59 = vadd.f32 %v1807_v60, %v733_v55 }
 0x20c   : > { %v766_v4 = vmax.f32 %v750_v59, 0.0 }
 0x20e   : > { %v775_v8 = vpack.c.bf16 %v767_v29, %v766_v4 }
 0x210   : > { %882 = vmatmul.bf16.gmra.mxu2 %v774_v27 }
 0x211   : > { %862 = vmatmul.bf16.gmra.mxu1 %v770_v53 }
 0x220   : > { %887 = vmatmul.bf16.gmra.mxu2 %v775_v8 }
 0x22d   : > { %v853_v5 = vpop.f32.mrf.mxu1 }
 0x22e   : > { %v854_v49 = vadd.f32 %v2019_v26, %v853_v5 }
 0x230   : > { %894 = vst.msk [vmem:[%s2022_s16] sm:$0xff] %vm893_vm12, %v854_v49 }
 0x235   : > { %v855_v9 = vpop.f32.mrf.mxu1 }
 0x236   : > { %v856_v45 = vadd.f32 %v2019_v26, %v855_v9 }
 0x238   : > { %895 = vst.msk [vmem:[%s2022_s16 + $0x8] sm:$0xff] %vm893_vm12, %v856_v45 }
 0x24a   : > { %v491_v21 = vpop.xlane.xlu0 %490 }
 0x24b   : > { %v516_v3 = vmul.f32 0.015625, %v491_v21 }
 0x24d   : > { %v532_v58 = vadd.f32 1e-05, %v516_v3 }
 0x24f   : > { %1398 = vrsqrt.f32 %v532_v58  ;;  %vm608_vm14 = vweird.f32 %v532_v58 }
 0x252   : > { %v493_v10 = vpop.xlane.xlu1 %492 }
 0x253   : > { %v517_v41 = vmul.f32 0.015625, %v493_v10 }
 0x255   : > { %v1399_v11 = vpop.eup %1398  ;;  %v533_v61 = vadd.f32 1e-05, %v517_v41 }
 0x256   : > { %v603_v62 = vmul.f32 %v1399_v11, %v532_v58  ;;  %vm609_vm13 = vweird.f32 %v1399_v11 }
 0x257   : > { %1400 = vrsqrt.f32 %v533_v61  ;;  %vm610_vm15 = vmor %vm608_vm14, %vm609_vm13  ;;  %vm618_vm1 = vweird.f32 %v533_v61 }
 0x258   : > { %v604_v38 = vmul.f32 %v1399_v11, %v603_v62 }
 0x25a   : > { %v605_v12 = vmul.f32 0.5, %v604_v38 }
 0x25c   : > { %v606_v20 = vsub.f32 1.5, %v605_v12 }
 0x25d   : > { %v1401_v40 = vpop.eup %1400 }
 0x25e   : > { %v607_v14 = vmul.f32 %v1399_v11, %v606_v20  ;;  %v613_v15 = vmul.f32 %v1401_v40, %v533_v61  ;;  %vm619_vm0 = vweird.f32 %v1401_v40 }
 0x25f   : > { %vm620_vm2 = vmor %vm618_vm1, %vm619_vm0 }
 0x260   : > { %v611_v16 = vsel %vm610_vm15, %v1399_v11, %v607_v14  ;;  %v614_v17 = vmul.f32 %v1401_v40, %v613_v15 }
 0x261   : > { %v708_v22 = vmul.f32 %v611_v16, %v1824_v39 }
 0x262   : > { %v615_v28 = vmul.f32 0.5, %v614_v17 }
 0x263   : > { %v725_v1 = vmul.f32 %v1802_v0, %v708_v22 }
 0x264   : > { %v616_v24 = vsub.f32 1.5, %v615_v28 }
 0x265   : > { %v742_v30 = vadd.f32 %v1807_v60, %v725_v1 }
 0x266   : > { %v617_v25 = vmul.f32 %v1401_v40, %v616_v24 }
 0x267   : > { %v758_v39 = vmax.f32 %v742_v30, 0.0 }
 0x268   : > { %v621_v54 = vsel %vm620_vm2, %v1401_v40, %v617_v25 }
 0x269   : > { %v709_v57 = vmul.f32 %v621_v54, %v1844_v6 }
 0x26b   : > { %v726_v32 = vmul.f32 %v1802_v0, %v709_v57 }
 0x26d   : > { %v743_v43 = vadd.f32 %v1807_v60, %v726_v32 }
 0x26f   : > { %v759_v34 = vmax.f32 %v743_v43, 0.0 }
 0x271   : > { %v771_v56 = vpack.c.bf16 %v759_v34, %v758_v39 }
 0x273   : > { %867 = vmatmul.bf16.gmra.mxu1 %v771_v56  ;;  %v873_v31 = vpop.f32.mrf.mxu2 }
 0x274   : > { %v874_v23 = vadd.f32 %v2019_v26, %v873_v31 }
 0x276   : > { %902 = vst.msk [vmem:[%s2022_s16 + $0x40] sm:$0xff] %vm893_vm12, %v874_v23 }
 0x27b   : > { %v875_v6 = vpop.f32.mrf.mxu2 }
 0x27c   : > { %v876_v35 = vadd.f32 %v2019_v26, %v875_v6 }
 0x27e   : > { %v858_v0 = vpop.f32.mrf.mxu1  ;;  %903 = vst.msk [vmem:[%s2022_s16 + $0x48] sm:$0xff] %vm893_vm12, %v876_v35 }
 0x27f   : > { %v859_v60 = vadd.f32 %v2019_v26, %v858_v0 }
 0x281   : > { %896 = vst.msk [vmem:[%s2022_s16 + $0x10] sm:$0xff] %vm893_vm12, %v859_v60 }
 0x283   : > { %v878_v18 = vpop.f32.mrf.mxu2 }
 0x284   : > { %v879_v19 = vadd.f32 %v2019_v26, %v878_v18 }
 0x286   : > { %v860_v37 = vpop.f32.mrf.mxu1  ;;  %904 = vst.msk [vmem:[%s2022_s16 + $0x50] sm:$0xff] %vm893_vm12, %v879_v19 }
 0x287   : > { %v861_v63 = vadd.f32 %v2019_v26, %v860_v37 }
 0x289   : > { %897 = vst.msk [vmem:[%s2022_s16 + $0x18] sm:$0xff] %vm893_vm12, %v861_v63 }
 0x28b   : > { %v880_v36 = vpop.f32.mrf.mxu2 }
 0x28c   : > { %v881_v7 = vadd.f32 %v2019_v26, %v880_v36 }
 0x28e   : > { %v863_v42 = vpop.f32.mrf.mxu1  ;;  %905 = vst.msk [vmem:[%s2022_s16 + $0x58] sm:$0xff] %vm893_vm12, %v881_v7 }
 0x28f   : > { %v864_v44 = vadd.f32 %v2019_v26, %v863_v42 }
 0x291   : > { %898 = vst.msk [vmem:[%s2022_s16 + $0x20] sm:$0xff] %vm893_vm12, %v864_v44 }
 0x293   : > { %v883_v46 = vpop.f32.mrf.mxu2 }
 0x294   : > { %v884_v48 = vadd.f32 %v2019_v26, %v883_v46 }
 0x296   : > { %v865_v47 = vpop.f32.mrf.mxu1  ;;  %906 = vst.msk [vmem:[%s2022_s16 + $0x60] sm:$0xff] %vm893_vm12, %v884_v48 }
 0x297   : > { %v866_v50 = vadd.f32 %v2019_v26, %v865_v47 }
 0x299   : > { %899 = vst.msk [vmem:[%s2022_s16 + $0x28] sm:$0xff] %vm893_vm12, %v866_v50 }
 0x29b   : > { %v885_v52 = vpop.f32.mrf.mxu2 }
 0x29c   : > { %v886_v53 = vadd.f32 %v2019_v26, %v885_v52 }
 0x29e   : > { %907 = vst.msk [vmem:[%s2022_s16 + $0x68] sm:$0xff] %vm893_vm12, %v886_v53 }
 0x2a3   : > { %v888_v27 = vpop.f32.mrf.mxu2 }
 0x2a4   : > { %v889_v51 = vadd.f32 %v2019_v26, %v888_v27 }
 0x2a6   : > { %908 = vst.msk [vmem:[%s2022_s16 + $0x70] sm:$0xff] %vm893_vm12, %v889_v51 }
 0x2ab   : > { %v890_v33 = vpop.f32.mrf.mxu2 }
 0x2ac   : > { %v891_v55 = vadd.f32 %v2019_v26, %v890_v33 }
 0x2ae   : > { %909 = vst.msk [vmem:[%s2022_s16 + $0x78] sm:$0xff] %vm893_vm12, %v891_v55 }
 0x2f0   : > { %v868_v13 = vpop.f32.mrf.mxu1 }
 0x2f1   : > { %v869_v59 = vadd.f32 %v2019_v26, %v868_v13 }
 0x2f3   : > { %900 = vst.msk [vmem:[%s2022_s16 + $0x30] sm:$0xff] %vm893_vm12, %v869_v59 }
 0x2f7   : > { %916 = sbr.rel (!%p1545_p4) target bundleno = 812 (0x32c), region = 44 }
 0x2f8   : > { %v870_v2 = vpop.f32.mrf.mxu1 }
 0x2f9   : > { %v871_v4 = vadd.f32 %v2019_v26, %v870_v2 }
 0x2fb   : > { %901 = vst.msk [vmem:[%s2022_s16 + $0x38] sm:$0xff] %vm893_vm12, %v871_v4 }
 0x2fc   : > { %s2209_s18 = smov (!%p919_p8, %s918_s18), 16 }
 0x2fd   : > { %s1243_s27 = sshll.u32 %s2209_s18, 3 }
 0x2fe   : > { %p1246_p9 = scmp.eq.s32.totalorder %s1243_s27, 0 }
 0x2ff   : > { %s2090_s28 = sshrl.u32 (!%p1246_p9), %s2209_s18, 4 }
 0x300   : > { %927 = sbr.rel (%p1246_p9) target bundleno = 812 (0x32c), region = 48  ;;  %p1247_p10 = scmp.le.s32.totalorder (!%p1246_p9), %s2090_s28, 0 }
 0x305   : > { %1142 = sbr.rel (%p1247_p10) target bundleno = 795 (0x31b), region = 124  ;;  %s2200_s21 = smov (!%p1247_p10), %s2084_s24 }
 0x306   : > { %s2201_s26 = smov (!%p1247_p10), %s2022_s16  ;;  %s2099_s29 = smov (!%p1247_p10), 0  }
 0x307   : > { %s2101_s30 = smov (!%p1247_p10), 0  }
 0x30a LB: >> { %v1020_v29 = vld [vmem:[%s1464_s26] sm:$0xff]  ;;  %v1022_v8 = vld [vmem:[%s1464_s26 + $0x8] sm:$0xff]  ;;  %v1024_v26 = vld [vmem:[%s1464_s26 + $0x10] sm:$0xff]  ;;  %s1052_s6 = sadd.s32 1, %s1468_s29  ;;  %s1014_s30 = sadd.s32 1, %s1472_s30   ;;  %s1472_s30 = sphi %s2101_s30, %s1014_s30   ;;  %s1468_s29 = sphi %s2099_s29, %s2204_s29   ;;  %s1464_s26 = sphi %s2201_s26, %s2203_s26   ;;  %s1460_s21 = sphi %s2200_s21, %s2202_s21  }
 0x30b   : >> { %1021 = vst [vmem:[%s1460_s21] sm:$0xff] %v1020_v29  ;;  %v1026_v5 = vld [vmem:[%s1464_s26 + $0x18] sm:$0xff]  ;;  %p1053_p11 = scmp.ge.s32.totalorder %s1052_s6, %s2090_s28  ;;  %v1028_v49 = vld [vmem:[%s1464_s26 + $0x20] sm:$0xff]  ;;  %v1030_v9 = vld [vmem:[%s1464_s26 + $0x28] sm:$0xff]  ;;  %p1013_p12 = scmp.ge.s32.totalorder %s1014_s30, %s2090_s28 }
 0x30c   : >> { %1023 = vst [vmem:[%s1460_s21 + $0x8] sm:$0xff] %v1022_v8  ;;  %v1032_v45 = vld [vmem:[%s1464_s26 + $0x30] sm:$0xff]  ;;  %v1034_v21 = vld [vmem:[%s1464_s26 + $0x38] sm:$0xff]  ;;  %v1036_v3 = vld [vmem:[%s1464_s26 + $0x40] sm:$0xff] }
 0x30d   : >> { %1025 = vst [vmem:[%s1460_s21 + $0x10] sm:$0xff] %v1024_v26  ;;  %s2211_s6 = smov (%p1053_p11, %s1052_s6), 0  ;;  %v1038_v58 = vld [vmem:[%s1464_s26 + $0x48] sm:$0xff]  ;;  %v1040_v10 = vld [vmem:[%s1464_s26 + $0x50] sm:$0xff]  ;;  %v1042_v41 = vld [vmem:[%s1464_s26 + $0x58] sm:$0xff] }
 0x30e   : >> { %1027 = vst [vmem:[%s1460_s21 + $0x18] sm:$0xff] %v1026_v5  ;;  %s1248_s7 = sshll.u32 %s2211_s6, 7  ;;  %v1044_v11 = vld [vmem:[%s1464_s26 + $0x60] sm:$0xff]  ;;  %v1046_v61 = vld [vmem:[%s1464_s26 + $0x68] sm:$0xff]  ;;  %v1048_v62 = vld [vmem:[%s1464_s26 + $0x70] sm:$0xff]  ;;  %s2204_s29 = smov %s2211_s6 }
 0x30f   : >> { %1029 = vst [vmem:[%s1460_s21 + $0x20] sm:$0xff] %v1028_v49  ;;  %s1057_s8 = scalar_lea.vmem %s2022_s16, %s1248_s7 [#allocation2]   ;;  %s1058_s9 = scalar_lea.vmem %s2084_s24, %s1248_s7   ;;  %v1050_v38 = vld [vmem:[%s1464_s26 + $0x78] sm:$0xff] }
 0x310   : >> { %1031 = vst [vmem:[%s1460_s21 + $0x28] sm:$0xff] %v1030_v9  ;;  %s2203_s26 = smov %s1057_s8 }
 0x311   : >> { %1033 = vst [vmem:[%s1460_s21 + $0x30] sm:$0xff] %v1032_v45 }
 0x312   : >> { %1035 = vst [vmem:[%s1460_s21 + $0x38] sm:$0xff] %v1034_v21 }
 0x313   : >> { %1037 = vst [vmem:[%s1460_s21 + $0x40] sm:$0xff] %v1036_v3 }
 0x314   : >> { %1039 = vst [vmem:[%s1460_s21 + $0x48] sm:$0xff] %v1038_v58 }
 0x315   : >> { %1041 = vst [vmem:[%s1460_s21 + $0x50] sm:$0xff] %v1040_v10 }
 0x316   : >> { %1043 = vst [vmem:[%s1460_s21 + $0x58] sm:$0xff] %v1042_v41  ;;  %1016 = sbr.rel (!%p1013_p12) target bundleno = 778 (0x30a), region = 130 }
 0x317   : >> { %1045 = vst [vmem:[%s1460_s21 + $0x60] sm:$0xff] %v1044_v11 }
 0x318   : >> { %1047 = vst [vmem:[%s1460_s21 + $0x68] sm:$0xff] %v1046_v61 }
 0x319   : >> { %1049 = vst [vmem:[%s1460_s21 + $0x70] sm:$0xff] %v1048_v62 }
 0x31a   : >> { %1051 = vst [vmem:[%s1460_s21 + $0x78] sm:$0xff] %v1050_v38  ;;  %s2202_s21 = smov %s1058_s9 }
 0x31b PF: > { %s2163_s10 = sand.u32 15, %s2209_s18   ;;  %s1269_s11 = sshll.u32 %s2090_s28, 7 }
 0x31c   : > { %s1063_s12 = scalar_lea.vmem %s2022_s16, %s1269_s11 [#allocation2]   ;;  %s1065_s13 = scalar_lea.vmem %s2084_s24, %s1269_s11  }
 0x31d   : > { %p1253_p13 = scmp.le.s32.totalorder %s2163_s10, 0 }
 0x31e   : > { %s1474_s14 = smov (!%p1253_p13), %s1065_s13   ;;  %s1478_s15 = smov (!%p1253_p13), %s1063_s12  }
 0x31f   : > { %1156 = sbr.rel (%p1253_p13) target bundleno = 812 (0x32c), region = 135  ;;  %s1482_s17 = smov (!%p1253_p13), 0  }
 0x320   : > { %s1486_s20 = smov (!%p1253_p13), 0  }
 0x324 LB: >> { %v1075_v12 = vld [vmem:[%s1480_s15] sm:$0xff]  ;;  %s1077_s18 = sadd.s32 1, %s1484_s17  ;;  %s1069_s20 = sadd.s32 1, %s1488_s20   ;;  %s1488_s20 = sphi %s1486_s20, %s1069_s20   ;;  %s1484_s17 = sphi %s1482_s17, %s1483_s17   ;;  %s1480_s15 = sphi %s1478_s15, %s1082_s15   ;;  %s1476_s14 = sphi %s1474_s14, %s1083_s14  }
 0x325   : >> { %1076 = vst [vmem:[%s1476_s14] sm:$0xff] %v1075_v12  ;;  %p1078_p0 = scmp.ge.s32.totalorder %s1077_s18, %s2163_s10  ;;  %p1068_p1 = scmp.ge.s32.totalorder %s1069_s20, %s2163_s10 }
 0x327   : >> { %s2213_s18 = smov (%p1078_p0, %s1077_s18), 0  ;;  %1071 = sbr.rel (!%p1068_p1) target bundleno = 804 (0x324), region = 141 }
 0x328   : >> { %s1254_s16 = sshll.u32 %s2213_s18, 3  ;;  %s1483_s17 = smov %s2213_s18  }
 0x329   : >> { %s1082_s15 = scalar_lea.vmem %s1063_s12, %s1254_s16 [#allocation2]   ;;  %s1083_s14 = scalar_lea.vmem %s1065_s13, %s1254_s16  }
 0x32c PF: > { %p12_p2 = scmp.ge.s32.totalorder %s1535_s22, 4   ;;  %s2205_s18 = smov %s1452_s19 }
 0x32d   : > { %s2206_s19 = smov %s1543_s25  ;;  %s2207_s20 = smov %s1535_s22 }
 0x32e   :  { %14 = sbr.rel (!%p12_p2) target bundleno = 2 (0x2), region = 152 }

</bundles_post_ra>
